<compile_context>
chip_gen: v5e
topology: v5e:2x2
jax: 0.10.0
libtpu: 0.0.40
codegen_flags: <defaults>
</compile_context>

<pallas_src>
import functools

import jax
import jax.numpy as jnp
from jax.experimental import pallas as pl
from jax.experimental.pallas import tpu as pltpu


def _scale_kernel(scale_ref, x_ref, o_ref):
    # scale_ref: (1,) f32 in SMEM (scalar prefetch).
    # x_ref, o_ref: (tile_rows, lane) lane-dense slabs.
    o_ref[...] = x_ref[...] * scale_ref[0].astype(x_ref.dtype)


def _pick_lane_width(n):
    """Largest 'nice' multiple of 128 that divides n (0 if none)."""
    for lane in (4096, 2048, 1024, 512, 256, 128):
        if n % lane == 0:
            return lane
    return 0


def _pick_row_tile(rows, lane, itemsize, per_buf_budget=2 * 1024 * 1024):
    """Fixed large row tile: ~2 MiB per buffer (~8 MiB total with
    double-buffered input + output), a multiple of 8 rows (sublane
    granularity), aiming for >=4 grid steps so both v7x TensorCores get
    balanced work.  Partial last block is masked by Pallas."""
    if rows <= 8:
        return rows                      # full extent; always a legal block
    t = max(8, per_buf_budget // (lane * itemsize))
    t = min(t, pl.cdiv(rows, 4))         # >= ~4 grid steps when possible
    t = max(8, (t // 8) * 8)             # multiple of 8 sublanes
    return min(t, rows)


@functools.partial(jax.jit, donate_argnums=(0,))
def scale_pallas(h, scale):
    """Elementwise  h * scale  via Pallas.  h: any float array, scale: (1,) f32."""
    n = h.size
    lane = _pick_lane_width(n)
    if lane:
        h_flat = h.reshape(n // lane, lane)
        pad = 0
    else:
        # Total size not a multiple of 128: pad the flattened activation up to
        # a full 128-lane slab (keeps every store unmasked / lane-dense).
        lane = 128
        pad = (-n) % lane
        h_flat = jnp.pad(h.reshape(-1), (0, pad)).reshape(-1, lane)

    rows = h_flat.shape[0]
    tile = _pick_row_tile(rows, lane, h_flat.dtype.itemsize)
    grid = (pl.cdiv(rows, tile),)

    cost = pl.CostEstimate(
        flops=rows * lane,
        transcendentals=0,
        bytes_accessed=2 * rows * lane * h_flat.dtype.itemsize + 4,
    )

    out_flat = pl.pallas_call(
        _scale_kernel,
        out_shape=jax.ShapeDtypeStruct((rows, lane), h_flat.dtype),
        grid_spec=pltpu.PrefetchScalarGridSpec(
            num_scalar_prefetch=1,
            grid=grid,
            in_specs=[pl.BlockSpec((tile, lane), lambda i, s_ref: (i, 0))],
            out_specs=pl.BlockSpec((tile, lane), lambda i, s_ref: (i, 0)),
        ),
        compiler_params=pltpu.CompilerParams(
            dimension_semantics=("parallel",),
            vmem_limit_bytes=32 * 1024 * 1024,
        ),
        cost_estimate=cost,
        # Donate h's HBM buffer: call args are (scale, h_flat) -> h_flat is 1.
        input_output_aliases={1: 0},
    )(scale, h_flat)

    if pad:
        out_flat = out_flat.reshape(-1)[:n]
    return out_flat.reshape(h.shape)


def scale_forward(x, scale, fn, **kwargs):
    """Pallas equivalent of Scale(scale, fn).forward(x, **kwargs)."""
    # TODO(synk): `fn` is an arbitrary wrapped nn.Module (FeedForward in the
    # conformer); it is applied as a plain JAX callable — only the `* scale`
    # epilogue is implemented as a Pallas kernel.
    h = fn(x, **kwargs)
    return scale_pallas(h, jnp.asarray([scale], jnp.float32))


if __name__ == "__main__":
    # Small shapes consistent with the module's use in a conformer block:
    # (batch, seq, hidden).
    B, T, D = 2, 8, 32
    scale = 0.5

    key = jax.random.PRNGKey(0)
    kx, k1, k2 = jax.random.split(key, 3)
    x = jax.random.normal(kx, (B, T, D), dtype=jnp.float32)

    # Small FeedForward stand-in for `fn` (conformer uses Scale(0.5, FeedForward)).
    w1 = jax.random.normal(k1, (D, 4 * D), jnp.float32) / (D ** 0.5)
    w2 = jax.random.normal(k2, (4 * D, D), jnp.float32) / ((4 * D) ** 0.5)

    def ff(v):
        return jax.nn.silu(v @ w1) @ w2

    y = scale_forward(x, scale, ff)
    y = jax.block_until_ready(y)

    # Reference: plain JAX  fn(x) * scale.
    y_ref = ff(x) * scale

    assert y.shape == (B, T, D), y.shape
    assert jnp.allclose(y, y_ref, atol=1e-6, rtol=1e-6), float(
        jnp.max(jnp.abs(y - y_ref)))
    print("KERNEL_OK")
</pallas_src>

<mosaic_0001>
module attributes {stable_mosaic.version = 11 : i64} {
  func.func @_scale_kernel(%arg0: i32, %arg1: memref<1xf32, #tpu.memory_space<smem>>, %arg2: memref<1x512xf32, #tpu.memory_space<vmem>>, %arg3: memref<1x512xf32, #tpu.memory_space<vmem>>) attributes {dimension_semantics = [#tpu.dimension_semantics<parallel>], iteration_bounds = array<i64: 1>, scalar_prefetch = 1 : i64, scratch_operands = 0 : i64, tpu.core_type = #tpu.core_type<tc>, window_params = [{transform_indices = @transform_0, window_bounds = array<i64: 1, 512>}, {transform_indices = @transform_1, window_bounds = array<i64: 1, 512>}]} {
    %c0 = arith.constant 0 : index
    %c0_0 = arith.constant 0 : index
    %0 = vector.load %arg2[%c0, %c0_0] : memref<1x512xf32, #tpu.memory_space<vmem>>, vector<1x512xf32>
    %c0_1 = arith.constant 0 : index
    %1 = memref.load %arg1[%c0_1] : memref<1xf32, #tpu.memory_space<smem>>
    %2 = vector.broadcast %1 : f32 to vector<1x512xf32>
    %3 = arith.mulf %0, %2 : vector<1x512xf32>
    %c0_2 = arith.constant 0 : index
    %c0_3 = arith.constant 0 : index
    %4 = vector.load %arg3[%c0_2, %c0_3] : memref<1x512xf32, #tpu.memory_space<vmem>>, vector<1x512xf32>
    tpu.vector_store %arg3[%c0_2, %c0_3], %3 {strides = array<i32>} : memref<1x512xf32, #tpu.memory_space<vmem>>, vector<1x512xf32>,
    return
  }
  func.func @transform_0(%arg0: i32, %arg1: memref<1xf32, #tpu.memory_space<smem>>) -> (i32, i32) {
    %c0_i32 = arith.constant 0 : i32
    %c0_i32_0 = arith.constant 0 : i32
    return %arg0, %c0_i32 : i32, i32
  }
  func.func @transform_1(%arg0: i32, %arg1: memref<1xf32, #tpu.memory_space<smem>>) -> (i32, i32) {
    %c0_i32 = arith.constant 0 : i32
    %c0_i32_0 = arith.constant 0 : i32
    return %arg0, %c0_i32 : i32, i32
  }
}

</mosaic_0001>

<bundles_post_ra>
// kernel: scale_pallas.1
= control target key start
LH: loop header
LB: loop body
LE: loop exit
PB: predicated region body
PF: predicated region fallthrough
CT: control target
= control target key end

     0   :  { %v14_v0 = vlaneseq  ;;  %s47_s0 = inlined_call_operand.<no memory space> [shape: f32[1], index: 0, kind: input, shape index: {}]   ;;  %s48_s1 = inlined_call_operand.vmem [shape: f32[1,512], index: 1, kind: input, shape index: {}, may-alias: {1,2}]   ;;  %s49_s2 = inlined_call_operand.vmem [shape: f32[1,512], index: 2, kind: output, shape index: {}, may-alias: {1,2}]  }
   0x1   :  { %v10_v1 = vld [vmem:[%s48_s1] sm:$0xf]  ;;  %v12_v2 = vstv %s47_s0 }
   0x2   :  { %v13_v3 = vmul.f32 %v12_v2, %v10_v1  ;;  %vm16_vm0 = vcmp.lt.s32.totalorder %v14_v0, 512 }
   0x4   :  { %18 = vst.msk [vmem:[%s49_s2] sm:$0xf] %vm16_vm0, %v13_v3 }

</bundles_post_ra>
